<compile_context>
chip_gen: v7x
topology: tpu7x:2x2x1
jax: 0.10.0
libtpu: 0.0.40
codegen_flags: <defaults>
</compile_context>

<pallas_src>
from functools import partial

import jax
import jax.numpy as jnp
from jax.experimental import pallas as pl
from jax.experimental.pallas import tpu as pltpu


def _gaussian_taps(ksize: int, sigma) -> jax.Array:
    """Traced 1-D Gaussian taps (matches torchvision _get_gaussian_kernel1d)."""
    sigma = jnp.asarray(sigma, jnp.float32)
    half = (ksize - 1) / 2.0
    x = jnp.arange(ksize, dtype=jnp.float32) - half
    pdf = jnp.exp(-0.5 * jnp.square(x / sigma))
    return pdf / jnp.sum(pdf)


def _vmem_capacity_bytes() -> int:
    """Physical VMEM of the current TPU generation (fallback: 64 MiB, v7x-safe)."""
    try:
        info = pltpu.get_tpu_info()
        return int(getattr(info, "vmem_capacity_bytes", 64 * 1024 * 1024))
    except Exception:  # no TPU info available at trace time
        return 64 * 1024 * 1024


def _choose_plane_block(nc: int, h: int, w: int, vmem_cap: int) -> int:
    """Planes per grid step.

    Block f32 footprint budget is generation-aware (~VMEM/24, clamped to
    [2 MiB, 8 MiB]) which keeps the in/out double-buffers plus the in-kernel
    f32 temporaries well inside VMEM while staying at/above the measured
    ~85%-of-HBM-roofline tile size.  At least 2 grid steps are kept when
    possible so v7x's two TensorCores both get work.
    """
    budget = min(max(vmem_cap // 24, 2 * 1024 * 1024), 8 * 1024 * 1024)
    per_plane = h * w * 4
    max_b = max(1, budget // max(per_plane, 1))
    b = min(nc, max_b)
    if nc >= 2 and b > (nc + 1) // 2:
        b = (nc + 1) // 2
    return max(b, 1)


def _make_blur_kernel(H: int, W: int, ky: int, kx: int, out_dtype):
    pad_x, pad_y = kx // 2, ky // 2
    is_int = jnp.issubdtype(jnp.dtype(out_dtype), jnp.integer)

    def kernel(wy_ref, wx_ref, x_ref, o_ref):
        x = x_ref[...].astype(jnp.float32)  # (B, H, W), f32 accumulation

        # ---- horizontal (lane-direction) pass ----------------------------
        # Reflect pad along W as one wide concatenate of edge column slices
        # (value-level: no masked 1-lane VMEM stores).
        if pad_x > 0:
            left = [x[:, :, t:t + 1] for t in range(pad_x, 0, -1)]        # cols p..1
            right = [x[:, :, W - 2 - t:W - 1 - t] for t in range(pad_x)]  # cols W-2..W-1-p
            xpad = jnp.concatenate(left + [x] + right, axis=2)            # (B, H, W+2p)
        else:
            xpad = x
        h = wx_ref[0] * xpad[:, :, 0:W]
        for j in range(1, kx):
            h = h + wx_ref[j] * xpad[:, :, j:j + W]

        # ---- vertical (sublane-direction) pass ----------------------------
        if pad_y > 0:
            top = [h[:, t:t + 1, :] for t in range(pad_y, 0, -1)]
            bot = [h[:, H - 2 - t:H - 1 - t, :] for t in range(pad_y)]
            hpad = jnp.concatenate(top + [h] + bot, axis=1)                # (B, H+2p, W)
        else:
            hpad = h
        acc = wy_ref[0] * hpad[:, 0:H, :]
        for i in range(1, ky):
            acc = acc + wy_ref[i] * hpad[:, i:i + H, :]

        if is_int:
            info = jnp.iinfo(out_dtype)
            acc = jnp.clip(jnp.round(acc), float(info.min), float(info.max))
        o_ref[...] = acc.astype(out_dtype)

    return kernel


@partial(jax.jit, static_argnames=("kernel_size",))
def gaussian_blur_pallas(image: jax.Array, sigma, kernel_size) -> jax.Array:
    """Depthwise Gaussian blur of an NCHW image; sigma is a traced scalar."""
    N, C, H, W = image.shape
    kx, ky = int(kernel_size[0]), int(kernel_size[1])
    pad_x, pad_y = kx // 2, ky // 2
    if pad_x >= W or pad_y >= H:
        raise ValueError(
            "kernel_size too large for image: reflect padding requires "
            "kernel_size // 2 < spatial dim.")

    wx = _gaussian_taps(kx, sigma)  # (kx,) f32
    wy = _gaussian_taps(ky, sigma)  # (ky,) f32

    nc = N * C
    x = image.reshape(nc, H, W)

    vmem_cap = _vmem_capacity_bytes()
    B = _choose_plane_block(nc, H, W, vmem_cap)

    # Pad the plane axis up to a block multiple (handles awkward N*C without
    # collapsing to 1-plane blocks); padded planes are ignored afterwards.
    nc_pad = ((nc + B - 1) // B) * B
    if nc_pad != nc:
        x = jnp.pad(x, ((0, nc_pad - nc), (0, 0), (0, 0)))
    grid = (nc_pad // B,)

    vmem_limit = int(min(0.75 * vmem_cap, 100 * 1024 * 1024))

    kernel = _make_blur_kernel(H, W, ky, kx, image.dtype)
    out = pl.pallas_call(
        kernel,
        out_shape=jax.ShapeDtypeStruct((nc_pad, H, W), image.dtype),
        grid=grid,
        in_specs=[
            pl.BlockSpec(memory_space=pltpu.MemorySpace.SMEM),   # wy taps
            pl.BlockSpec(memory_space=pltpu.MemorySpace.SMEM),   # wx taps
            pl.BlockSpec((B, H, W), lambda i: (i, 0, 0)),
        ],
        out_specs=pl.BlockSpec((B, H, W), lambda i: (i, 0, 0)),
        compiler_params=pltpu.CompilerParams(
            dimension_semantics=("parallel",),
            vmem_limit_bytes=vmem_limit,
        ),
    )(wy, wx, x)

    if nc_pad != nc:
        out = out[:nc]
    return out.reshape(N, C, H, W)


def _reference_blur(image, kernel_size, sigma):
    """Pure-JAX dense 2-D conv reference (reflect pad), for the sanity check."""
    kx, ky = kernel_size
    wx = _gaussian_taps(kx, sigma)
    wy = _gaussian_taps(ky, sigma)
    k2d = wy[:, None] * wx[None, :]
    N, C, H, W = image.shape
    xp = jnp.pad(image.astype(jnp.float32),
                 ((0, 0), (0, 0), (ky // 2, ky // 2), (kx // 2, kx // 2)),
                 mode="reflect")
    out = jnp.zeros((N, C, H, W), jnp.float32)
    for i in range(ky):
        for j in range(kx):
            out = out + k2d[i, j] * xp[:, :, i:i + H, j:j + W]
    if jnp.issubdtype(image.dtype, jnp.integer):
        info = jnp.iinfo(image.dtype)
        out = jnp.clip(jnp.round(out), float(info.min), float(info.max))
    return out.astype(image.dtype)


class GaussianBlur:
    """JAX/Pallas port of the PyTorch GaussianBlur augmentation (image only)."""

    def __init__(self, kernel_size, sigma=(0.1, 2.0)):
        if isinstance(kernel_size, (int, float)):
            kernel_size = (int(kernel_size), int(kernel_size))
        kernel_size = tuple(int(k) for k in kernel_size)
        if len(kernel_size) == 1:
            kernel_size = (kernel_size[0], kernel_size[0])
        if len(kernel_size) != 2:
            raise ValueError("Kernel size should be a tuple/list of two integers")
        for ks in kernel_size:
            if ks <= 0 or ks % 2 == 0:
                raise ValueError("Kernel size value should be an odd and positive number.")
        if isinstance(sigma, (int, float)):
            if sigma <= 0:
                raise ValueError("If sigma is a single number, it must be positive.")
            sigma = (float(sigma), float(sigma))
        else:
            sigma = tuple(float(s) for s in sigma)
            if len(sigma) != 2 or not 0.0 < sigma[0] <= sigma[1]:
                raise ValueError("sigma values should be positive and of the form (min, max).")
        self.kernel_size = kernel_size
        self.sigma = sigma

    def get_params(self, key) -> jax.Array:
        # Traced sigma: no host sync, no per-sigma recompilation of the kernel.
        return jax.random.uniform(key, (), jnp.float32,
                                  minval=self.sigma[0], maxval=self.sigma[1])

    def __call__(self, image, mask, key):
        sigma = self.get_params(key)
        return gaussian_blur_pallas(image, sigma, self.kernel_size), mask


if __name__ == "__main__":
    key = jax.random.PRNGKey(0)
    k_img, k_mask, k_sigma = jax.random.split(key, 3)

    # Small NCHW image + per-sample HW mask, consistent with the augmentation module.
    image = jax.random.uniform(k_img, (2, 4, 16, 16), dtype=jnp.float32)
    mask = jax.random.randint(k_mask, (2, 16, 16), 0, 5, dtype=jnp.int32)

    blur = GaussianBlur(kernel_size=5, sigma=(0.1, 2.0))
    blurred, mask_out = blur(image, mask, k_sigma)
    jax.block_until_ready(blurred)
    jax.block_until_ready(mask_out)

    # Sanity check against a dense 2-D reflect-padded conv reference.
    sigma = blur.get_params(k_sigma)           # same key -> same sigma
    ref = _reference_blur(image, blur.kernel_size, sigma)

    assert blurred.shape == image.shape and blurred.dtype == image.dtype
    assert mask_out.shape == mask.shape and mask_out.dtype == mask.dtype
    assert float(jnp.max(jnp.abs(blurred - ref))) < 1e-5
    print("KERNEL_OK")
</pallas_src>

<mosaic_0001>
module attributes {stable_mosaic.version = 11 : i64} {
  func.func @kernel(%arg0: i32, %arg1: memref<5xf32, #tpu.memory_space<smem>>, %arg2: memref<5xf32, #tpu.memory_space<smem>>, %arg3: memref<4x16x16xf32, #tpu.memory_space<vmem>>, %arg4: memref<4x16x16xf32, #tpu.memory_space<vmem>>) attributes {dimension_semantics = [#tpu.dimension_semantics<parallel>], iteration_bounds = array<i64: 2>, scalar_prefetch = 0 : i64, scratch_operands = 0 : i64, tpu.core_type = #tpu.core_type<tc>, window_params = [{transform_indices = @transform_0, window_bounds = array<i64: 5>}, {transform_indices = @transform_1, window_bounds = array<i64: 5>}, {transform_indices = @transform_2, window_bounds = array<i64: 4, 16, 16>}, {transform_indices = @transform_3, window_bounds = array<i64: 4, 16, 16>}]} {
    %c0 = arith.constant 0 : index
    %c0_0 = arith.constant 0 : index
    %c0_1 = arith.constant 0 : index
    %0 = vector.load %arg3[%c0, %c0_0, %c0_1] : memref<4x16x16xf32, #tpu.memory_space<vmem>>, vector<4x16x16xf32>
    %1 = vector.extract_strided_slice %0 {offsets = [0, 0, 2], sizes = [4, 16, 1], strides = [1, 1, 1]} : vector<4x16x16xf32> to vector<4x16x1xf32>
    %2 = vector.extract_strided_slice %0 {offsets = [0, 0, 1], sizes = [4, 16, 1], strides = [1, 1, 1]} : vector<4x16x16xf32> to vector<4x16x1xf32>
    %3 = vector.extract_strided_slice %0 {offsets = [0, 0, 14], sizes = [4, 16, 1], strides = [1, 1, 1]} : vector<4x16x16xf32> to vector<4x16x1xf32>
    %4 = vector.extract_strided_slice %0 {offsets = [0, 0, 13], sizes = [4, 16, 1], strides = [1, 1, 1]} : vector<4x16x16xf32> to vector<4x16x1xf32>
    %5 = tpu.concatenate %1, %2, %0, %3, %4 in 2 : vector<4x16x1xf32>, vector<4x16x1xf32>, vector<4x16x16xf32>, vector<4x16x1xf32>, vector<4x16x1xf32> -> vector<4x16x20xf32>
    %c0_2 = arith.constant 0 : index
    %6 = memref.load %arg2[%c0_2] : memref<5xf32, #tpu.memory_space<smem>>
    %7 = vector.extract_strided_slice %5 {offsets = [0, 0, 0], sizes = [4, 16, 16], strides = [1, 1, 1]} : vector<4x16x20xf32> to vector<4x16x16xf32>
    %8 = vector.broadcast %6 : f32 to vector<4x16x16xf32>
    %9 = arith.mulf %8, %7 : vector<4x16x16xf32>
    %c1 = arith.constant 1 : index
    %10 = memref.load %arg2[%c1] : memref<5xf32, #tpu.memory_space<smem>>
    %11 = vector.extract_strided_slice %5 {offsets = [0, 0, 1], sizes = [4, 16, 16], strides = [1, 1, 1]} : vector<4x16x20xf32> to vector<4x16x16xf32>
    %12 = vector.broadcast %10 : f32 to vector<4x16x16xf32>
    %13 = arith.mulf %12, %11 : vector<4x16x16xf32>
    %14 = arith.addf %9, %13 : vector<4x16x16xf32>
    %c2 = arith.constant 2 : index
    %15 = memref.load %arg2[%c2] : memref<5xf32, #tpu.memory_space<smem>>
    %16 = vector.extract_strided_slice %5 {offsets = [0, 0, 2], sizes = [4, 16, 16], strides = [1, 1, 1]} : vector<4x16x20xf32> to vector<4x16x16xf32>
    %17 = vector.broadcast %15 : f32 to vector<4x16x16xf32>
    %18 = arith.mulf %17, %16 : vector<4x16x16xf32>
    %19 = arith.addf %14, %18 : vector<4x16x16xf32>
    %c3 = arith.constant 3 : index
    %20 = memref.load %arg2[%c3] : memref<5xf32, #tpu.memory_space<smem>>
    %21 = vector.extract_strided_slice %5 {offsets = [0, 0, 3], sizes = [4, 16, 16], strides = [1, 1, 1]} : vector<4x16x20xf32> to vector<4x16x16xf32>
    %22 = vector.broadcast %20 : f32 to vector<4x16x16xf32>
    %23 = arith.mulf %22, %21 : vector<4x16x16xf32>
    %24 = arith.addf %19, %23 : vector<4x16x16xf32>
    %c4 = arith.constant 4 : index
    %25 = memref.load %arg2[%c4] : memref<5xf32, #tpu.memory_space<smem>>
    %26 = vector.extract_strided_slice %5 {offsets = [0, 0, 4], sizes = [4, 16, 16], strides = [1, 1, 1]} : vector<4x16x20xf32> to vector<4x16x16xf32>
    %27 = vector.broadcast %25 : f32 to vector<4x16x16xf32>
    %28 = arith.mulf %27, %26 : vector<4x16x16xf32>
    %29 = arith.addf %24, %28 : vector<4x16x16xf32>
    %30 = vector.extract_strided_slice %29 {offsets = [0, 2, 0], sizes = [4, 1, 16], strides = [1, 1, 1]} : vector<4x16x16xf32> to vector<4x1x16xf32>
    %31 = vector.extract_strided_slice %29 {offsets = [0, 1, 0], sizes = [4, 1, 16], strides = [1, 1, 1]} : vector<4x16x16xf32> to vector<4x1x16xf32>
    %32 = vector.extract_strided_slice %29 {offsets = [0, 14, 0], sizes = [4, 1, 16], strides = [1, 1, 1]} : vector<4x16x16xf32> to vector<4x1x16xf32>
    %33 = vector.extract_strided_slice %29 {offsets = [0, 13, 0], sizes = [4, 1, 16], strides = [1, 1, 1]} : vector<4x16x16xf32> to vector<4x1x16xf32>
    %34 = tpu.concatenate %30, %31, %29, %32, %33 in 1 : vector<4x1x16xf32>, vector<4x1x16xf32>, vector<4x16x16xf32>, vector<4x1x16xf32>, vector<4x1x16xf32> -> vector<4x20x16xf32>
    %c0_3 = arith.constant 0 : index
    %35 = memref.load %arg1[%c0_3] : memref<5xf32, #tpu.memory_space<smem>>
    %36 = vector.extract_strided_slice %34 {offsets = [0, 0, 0], sizes = [4, 16, 16], strides = [1, 1, 1]} : vector<4x20x16xf32> to vector<4x16x16xf32>
    %37 = vector.broadcast %35 : f32 to vector<4x16x16xf32>
    %38 = arith.mulf %37, %36 : vector<4x16x16xf32>
    %c1_4 = arith.constant 1 : index
    %39 = memref.load %arg1[%c1_4] : memref<5xf32, #tpu.memory_space<smem>>
    %40 = vector.extract_strided_slice %34 {offsets = [0, 1, 0], sizes = [4, 16, 16], strides = [1, 1, 1]} : vector<4x20x16xf32> to vector<4x16x16xf32>
    %41 = vector.broadcast %39 : f32 to vector<4x16x16xf32>
    %42 = arith.mulf %41, %40 : vector<4x16x16xf32>
    %43 = arith.addf %38, %42 : vector<4x16x16xf32>
    %c2_5 = arith.constant 2 : index
    %44 = memref.load %arg1[%c2_5] : memref<5xf32, #tpu.memory_space<smem>>
    %45 = vector.extract_strided_slice %34 {offsets = [0, 2, 0], sizes = [4, 16, 16], strides = [1, 1, 1]} : vector<4x20x16xf32> to vector<4x16x16xf32>
    %46 = vector.broadcast %44 : f32 to vector<4x16x16xf32>
    %47 = arith.mulf %46, %45 : vector<4x16x16xf32>
    %48 = arith.addf %43, %47 : vector<4x16x16xf32>
    %c3_6 = arith.constant 3 : index
    %49 = memref.load %arg1[%c3_6] : memref<5xf32, #tpu.memory_space<smem>>
    %50 = vector.extract_strided_slice %34 {offsets = [0, 3, 0], sizes = [4, 16, 16], strides = [1, 1, 1]} : vector<4x20x16xf32> to vector<4x16x16xf32>
    %51 = vector.broadcast %49 : f32 to vector<4x16x16xf32>
    %52 = arith.mulf %51, %50 : vector<4x16x16xf32>
    %53 = arith.addf %48, %52 : vector<4x16x16xf32>
    %c4_7 = arith.constant 4 : index
    %54 = memref.load %arg1[%c4_7] : memref<5xf32, #tpu.memory_space<smem>>
    %55 = vector.extract_strided_slice %34 {offsets = [0, 4, 0], sizes = [4, 16, 16], strides = [1, 1, 1]} : vector<4x20x16xf32> to vector<4x16x16xf32>
    %56 = vector.broadcast %54 : f32 to vector<4x16x16xf32>
    %57 = arith.mulf %56, %55 : vector<4x16x16xf32>
    %58 = arith.addf %53, %57 : vector<4x16x16xf32>
    %c0_8 = arith.constant 0 : index
    %c0_9 = arith.constant 0 : index
    %c0_10 = arith.constant 0 : index
    %59 = vector.load %arg4[%c0_8, %c0_9, %c0_10] : memref<4x16x16xf32, #tpu.memory_space<vmem>>, vector<4x16x16xf32>
    tpu.vector_store %arg4[%c0_8, %c0_9, %c0_10], %58 {strides = array<i32>} : memref<4x16x16xf32, #tpu.memory_space<vmem>>, vector<4x16x16xf32>,
    return
  }
  func.func @transform_0(%arg0: i32) -> i32 {
    %c0_i32 = arith.constant 0 : i32
    %c0_i32_0 = arith.constant 0 : i32
    return %c0_i32 : i32
  }
  func.func @transform_1(%arg0: i32) -> i32 {
    %c0_i32 = arith.constant 0 : i32
    %c0_i32_0 = arith.constant 0 : i32
    return %c0_i32 : i32
  }
  func.func @transform_2(%arg0: i32) -> (i32, i32, i32) {
    %c0_i32 = arith.constant 0 : i32
    %c0_i32_0 = arith.constant 0 : i32
    %c0_i32_1 = arith.constant 0 : i32
    return %arg0, %c0_i32, %c0_i32_0 : i32, i32, i32
  }
  func.func @transform_3(%arg0: i32) -> (i32, i32, i32) {
    %c0_i32 = arith.constant 0 : i32
    %c0_i32_0 = arith.constant 0 : i32
    %c0_i32_1 = arith.constant 0 : i32
    return %arg0, %c0_i32, %c0_i32_0 : i32, i32, i32
  }
}

</mosaic_0001>

<bundles_post_ra>
// kernel: gaussian_blur_pallas.1
= control target key start
LH: loop header
LB: loop body
LE: loop exit
PB: predicated region body
PF: predicated region fallthrough
CT: control target
= control target key end

     0   :  { %8 = vsyncpa [#allocation5], 0  ;;  %s1870_s0 = inlined_call_operand.vmem [shape: f32[5], index: 0, kind: input, shape index: {}, may-alias: {0,1}]   ;;  %s1871_s1 = inlined_call_operand.vmem [shape: f32[5], index: 1, kind: input, shape index: {}, may-alias: {0,1}]   ;;  %s1872_s2 = inlined_call_operand.hbm [shape: f32[8,16,16], index: 2, kind: input, shape index: {}]   ;;  %s1873_s3 = inlined_call_operand.hbm [shape: f32[8,16,16], index: 3, kind: output, shape index: {}]  }
   0x1   :  { %9 = vsyncpa [#allocation7], 0 }
   0x2   :  { %10 = vsyncpa [#allocation3], 0 }
   0x3   :  { %12 = vsyncpa [#allocation3 + $0x1], 0 }
   0x4   :  { %13 = vsyncpa [#allocation4], 0 }
   0x5   :  { %15 = vsyncpa [#allocation4 + $0x1], 0  ;;  %s1314_s12 = smov 0   ;;  %s1316_s13 = smov 0  }
   0x6   :  { %s1318_s14 = smov 0   ;;  %s1320_s15 = smov 0  }
   0x7 LB: > { %s1335_s16 = sadd.s32 4294967295, %s1277_s15   ;;  %s1033_s17 = sadd.s32 4294967294, %s1277_s15   ;;  %s1277_s15 = sphi %s1320_s15, %s1899_s15   ;;  %s1273_s14 = sphi %s1318_s14, %s1898_s14   ;;  %s1269_s13 = sphi %s1316_s13, %s1897_s13   ;;  %s1265_s12 = sphi %s1314_s12, %s1896_s12  }
   0x8   : > { %s1339_s18 = sadd.s32 1, %s1277_s15   ;;  %s70_s19 = sadd.s32 1, %s1273_s14 }
   0x9   : > { %s67_s20 = ssub.s32 %s1277_s15, %s1339_s18  ;;  %p77_p0 = scmp.ne.s32.totalorder %s1273_s14, %s1269_s13 }
   0xa   : > { %p68_p1 = scmp.eq.s32.totalorder %s67_s20, 0  ;;  %p78_p2 = scmp.eq.s32.totalorder %s1277_s15, 0 }
   0xb   : > { %p83_p3 = scmp.ne.s32.totalorder %s1269_s13, %s1265_s12  ;;  %p1874_p4 = scmp.eq.s32.totalorder %s1335_s16, 0 }
   0xc   : > { %s1351_s21 = scalar_select %p68_p1, %s1273_s14, %s70_s19  }
   0xd   : > { %p1353_p5 = por %p78_p2, %p77_p0  ;;  %p1359_p6 = por %p1874_p4, %p83_p3 }
   0xe   : > { %p107_p7 = scmp.eq.s32.totalorder %s1335_s16, 1  ;;  %p113_p8 = scmp.eq.s32.totalorder %s1033_s17, 1 }
   0xf   : > { %s1880_s23 = scalar_select %p1359_p6, 1, 0 }
  0x10   : > { %p1034_p9 = scmp.ge.s32.totalorder %s1277_s15, 1  ;;  %p120_p10 = scmp.lt.s32.totalorder %s1277_s15, 3 }
  0x11   : > { %p1366_p11 = por %p107_p7, %p77_p0  ;;  %p1370_p12 = por %p113_p8, %p83_p3 }
  0x12   : > { %p1374_p13 = pnand %p1034_p9, %p120_p10  ;;  %s133_s29 = sshll.u32 %s1870_s0, 4  ;;  %s134_s29 = int_to_ptr.vmem [resolvable:$true] %s133_s29 }
  0x13   : > { %s1881_s24 = scalar_select %p1366_p11, 1, 0 }
  0x14   : > { %s1882_s25 = scalar_select %p1370_p12, 1, 0 }
  0x15   : > { %s1883_s26 = scalar_select %p1374_p13, 1, 0 }
  0x16   : > { %p1077_p1 = pneg %p1374_p13  ;;  %p1094_p2 = scmp.lt.s32.totalorder %s1277_s15, 2 }
  0x17   : > { %s144_s6 = sshll.u32 %s1871_s1, 4  ;;  %s1143_s8 = scalar_lea.vmem %s134_s29, 16  ;;  %s145_s6 = int_to_ptr.vmem [resolvable:$true] %s144_s6 }
  0x18   : > { %p1387_p7 = pnand %p1077_p1, %p1874_p4  ;;  %p1396_p3 = pnand %p1094_p2, %p1353_p5 }
  0x19   : > { %p1144_p8 = scmp.ne.s32.totalorder %s134_s29, %s1143_s8  ;;  %p1151_p0 = scmp.lt.s32.totalorder %s134_s29, %s134_s29 }
  0x1a   : > { %s1885_s7 = scalar_select %p1396_p3, 1, 0 }
  0x1b   : > { %p1145_p9 = pneg %p1387_p7  ;;  %p1152_p4 = scmp.lt.s32.totalorder %s1143_s8, %s1143_s8 }
  0x1d   : > { %p1146_p10 = pnand %p1145_p9, %p1144_p8  ;;  %p1153_p12 = por %p1152_p4, %p1151_p0 }
  0x1f   : > { %p1147_p1 = pneg %p1146_p10 }
  0x21   : > { %p1154_p11 = pnand %p1153_p12, %p1147_p1 }
  0x23   : > { %1157 = shalt.err (!%p1154_p11)
}
  0x24   : > { %s1279_s9 = smov [#allocation2]   ;;  %s155_s10 = sand.u32 1, %s1273_s14  }
  0x25   : > { %1080 = dma.vmem_to_smem (!%p1387_p7), %s134_s29, 16, %s1279_s9, [#allocation5]  }
  0x26   : > { %s1158_s11 = scalar_lea.vmem %s145_s6, 16  ;;  %p1166_p8 = scmp.lt.s32.totalorder %s145_s6, %s145_s6 }
  0x27   : > { %p1159_p5 = scmp.ne.s32.totalorder %s145_s6, %s1158_s11  ;;  %p1167_p10 = scmp.lt.s32.totalorder %s1158_s11, %s1158_s11 }
  0x29   : > { %p1161_p2 = pnand %p1159_p5, %p1145_p9  ;;  %p1168_p13 = por %p1167_p10, %p1166_p8 }
  0x2b   : > { %p1162_p6 = pneg %p1161_p2 }
  0x2d   : > { %p1169_p3 = pnand %p1168_p13, %p1162_p6 }
  0x2f   : > { %1172 = shalt.err (!%p1169_p3)
}
  0x30   : > { %s1280_s17 = smov [#allocation6]   ;;  %s1038_s19 = sshll.u32 %s155_s10, 6 }
  0x31   : > { %1083 = dma.vmem_to_smem (!%p1387_p7), %s145_s6, 16, %s1280_s17, [#allocation7]  }
  0x32   : > { %s1062_s20 = sshll.u32 %s1277_s15, 10  ;;  %s159_s29 = scalar_lea.vmem [#allocation8], %s1038_s19 }
  0x33   : > { %s1417_s28 = scalar_lea.hbm %s1872_s2, %s1062_s20  ;;  %s167_s4 = sshll.u32 %s159_s29, 4  ;;  %s1419_s4 = int_to_ptr.vmem [resolvable:$true] %s167_s4 }
  0x34   : > { %s1421_s30 = scalar_lea.sflag [#allocation3], %s155_s10  ;;  %s1173_s5 = scalar_lea.hbm %s1417_s28, 1024 }
  0x35   : > { %p1174_p4 = scmp.ne.s32.totalorder %s1417_s28, %s1173_s5  ;;  %p1886_p6 = scmp.ne.s32.totalorder %s1885_s7, 0 }
  0x36   : > { %s1178_s9 = scalar_lea.hbm %s1872_s2, 2048  ;;  %p1179_p0 = scmp.lt.u32.totalorder %s1417_s28, %s1872_s2 }
  0x37   : > { %p1175_p11 = pneg %p1886_p6  ;;  %p1180_p7 = scmp.lt.u32.totalorder %s1178_s9, %s1173_s5 }
  0x38   : > { %p1182_p9 = scmp.lt.u32.totalorder %s1173_s5, %s1417_s28 }
  0x39   : > { %p1176_p12 = pnand %p1175_p11, %p1174_p4  ;;  %p1181_p3 = por %p1180_p7, %p1179_p0 }
  0x3b   : > { %p1177_p13 = pneg %p1176_p12  ;;  %p1183_p1 = por %p1182_p9, %p1181_p3 }
  0x3d   : > { %p1184_p5 = pnand %p1183_p1, %p1177_p13 }
  0x3f   : > { %1187 = shalt.err (!%p1184_p5)
}
  0x40   : > { %s1188_s10 = scalar_lea.vmem %s1419_s4, 1024  ;;  %s1281_s19 = smov [#allocation8]  }
  0x41   : > { %p1189_p2 = scmp.ne.s32.totalorder %s1419_s4, %s1188_s10  ;;  %s1193_s20 = sshll.u32 %s1281_s19, 4  ;;  %s1194_s20 = int_to_ptr.vmem [resolvable:$false] %s1193_s20 }
  0x42   : > { %s1195_s22 = scalar_lea.vmem %s1194_s20, 2048  ;;  %p1196_p4 = scmp.lt.s32.totalorder %s1419_s4, %s1194_s20 }
  0x43   : > { %p1191_p8 = pnand %p1189_p2, %p1175_p11  ;;  %p1197_p12 = scmp.lt.s32.totalorder %s1195_s22, %s1188_s10 }
  0x45   : > { %p1192_p10 = pneg %p1191_p8  ;;  %p1198_p0 = por %p1197_p12, %p1196_p4 }
  0x47   : > { %p1199_p7 = pnand %p1198_p0, %p1192_p10 }
  0x49   : > { %1202 = shalt.err (!%p1199_p7)
}
  0x4a   : > { %s1282_s27 = smov 128   ;;  %s1283_s29 = smov 8  }
  0x4b   : > { %1087 = dma.hbm_to_vmem [thread:$0]  (!%p1886_p6), %s1417_s28, 1024, %s1419_s4, %s1421_s30, %s1282_s27, %s1282_s27, %s1283_s29  }
  0x4c   : > { %p1887_p11 = scmp.ne.s32.totalorder %s1883_s26, 0 }
  0x4d   : > { %p1888_p13 = scmp.eq.s32.totalorder (!%p1887_p11), %s1335_s16, 0 }
  0x4e   : > { %179 = sbr.rel (%p1887_p11) target bundleno = 503 (0x1f7), region = 32 }
  0x55   : > { %1248 = dma.done.wait (%p1888_p13), [#allocation5], 16   ;;  %p1889_p3 = pmov %p1888_p13 }
  0x57   : > { %1250 = vsyncadd (%p1889_p3), [#allocation5], 4294967280  ;;  %p1890_p9 = pmov %p1889_p3 }
  0x58   : > { %p1891_p1 = pmov %p1889_p3 }
  0x59   : > { %1252 = dma.done.wait (%p1890_p9), [#allocation7], 16  }
  0x5a   : > { %1254 = vsyncadd (%p1891_p1), [#allocation7], 4294967280  ;;  %s1460_s5 = sand.u32 1, %s1269_s13   ;;  %p1892_p6 = scmp.ne.s32.totalorder %s1880_s23, 0 }
  0x5b   : > { %s1045_s26 = sshll.u32 %s1460_s5, 6  ;;  %s190_s7 = scalar_lea.sflag [#allocation3], %s1460_s5 }
  0x5c   : > { %s193_s28 = scalar_lea.vmem [#allocation8], %s1045_s26 }
  0x5d   : > { %1256 = dma.done.wait (%p1892_p6), %s190_s7, 1024  }
  0x5e   : > { %1258 = vsyncadd (%p1892_p6), %s190_s7, 4294966272 }
  0x5f   : > { %198 = sfence }
  0x60   : > { %v1470_v0 = vld [vmem:[%s193_s28 + $0x10] sm:$0xff]  ;;  %v1472_v1 = vld [vmem:[%s193_s28] sm:$0xff]  ;;  %s1284_s4 = smov 126   ;;  %v1478_v2 = vld [vmem:[%s193_s28 + $0x18] sm:$0xff]  ;;  %s1285_s23 = smov 2   ;;  %vm331_vm0 = vcmask 7168  }
  0x61   : > { %239 = vrot.lane.b32.xlu1 %v1470_v0, %s1284_s4  ;;  %235 = vrot.lane.b32.xlu0 %v1472_v1, %s1284_s4  ;;  %v1480_v3 = vld [vmem:[%s193_s28 + $0x8] sm:$0xff]  ;;  %v1488_v5 = vld [vmem:[%s193_s28 + $0x20] sm:$0xff]  ;;  %s1286_s30 = smov 4   ;;  %s1287_s6 = smov 6   ;;  %vm340_vm1 = vcmask 15360   ;;  %vm349_vm2 = vcmask 146432  }
  0x62   : > { %v1486_v4 = vld [vmem:[%s193_s28 + $0x28] sm:$0xff]  ;;  %v1494_v6 = vld [vmem:[%s193_s28 + $0x38] sm:$0xff]  ;;  %v1496_v7 = vld [vmem:[%s193_s28 + $0x30] sm:$0xff]  ;;  %s1047_s8 = sld [smem:[#allocation6 + $0x1]]  ;;  %vm358_vm3 = vcmask 154624   ;;  %s1288_s9 = smov 127  }
  0x63   : > { %s1048_s11 = sld [smem:[#allocation6 + $0x2]]  ;;  %s1049_s17 = sld [smem:[#allocation6 + $0x3]]  ;;  %vm593_vm4 = vcmask 1041408   ;;  %vm647_vm5 = vcmask 1042432   ;;  %vm634_vm6 = vcmask 1040384   ;;  %vm688_vm7 = vcmask 1046528  }
  0x64   : > { %s1289_s10 = smov 125   ;;  %s1050_s19 = sld [smem:[#allocation6 + $0x4]]  ;;  %vm751_vm8 = vcmask 1045504   ;;  %vm814_vm9 = vcmask 1044480   ;;  %vm877_vm10 = vcmask 1043456   ;;  %vm914_vm11 = vcmask 130048  }
  0x65   : > { %241 = vrot.lane.b32.xlu1 %v1478_v2, %s1284_s4  ;;  %237 = vrot.lane.b32.xlu0 %v1480_v3, %s1284_s4  ;;  %s1290_s20 = smov 124   ;;  %s367_s22 = sld [smem:[#allocation6]] }
  0x66   : > { %s1051_s27 = sld [smem:[#allocation2 + $0x1]]  ;;  %s1052_s29 = sld [smem:[#allocation2 + $0x2]] }
  0x67   : > { %s1053_s7 = sld [smem:[#allocation2 + $0x3]]  ;;  %s1054_s28 = sld [smem:[#allocation2 + $0x4]] }
  0x68   : > { %v378_v36 = vstv %s1047_s8  ;;  %p1893_p2 = scmp.ne.s32.totalorder %s1881_s24, 0 }
  0x69   : > { %245 = vrot.lane.b32.xlu1 %v1486_v4, %s1284_s4  ;;  %243 = vrot.lane.b32.xlu0 %v1488_v5, %s1284_s4 }
  0x6d   : > { %249 = vrot.lane.b32.xlu1 %v1494_v6, %s1284_s4  ;;  %247 = vrot.lane.b32.xlu0 %v1496_v7, %s1284_s4 }
  0x71   : > { %261 = vrot.lane.b32.xlu1 %v1480_v3, %s1285_s23  ;;  %259 = vrot.lane.b32.xlu0 %v1472_v1, %s1285_s23 }
  0x75   : > { %265 = vrot.lane.b32.xlu1 %v1478_v2, %s1285_s23  ;;  %263 = vrot.lane.b32.xlu0 %v1470_v0, %s1285_s23 }
  0x79   : > { %269 = vrot.lane.b32.xlu1 %v1486_v4, %s1285_s23  ;;  %267 = vrot.lane.b32.xlu0 %v1488_v5, %s1285_s23 }
  0x7d   : > { %273 = vrot.lane.b32.xlu1 %v1494_v6, %s1285_s23  ;;  %271 = vrot.lane.b32.xlu0 %v1496_v7, %s1285_s23  ;;  %s1714_s23 = scalar_lea.vmem [#allocation9], %s1045_s26  ;;  %s1064_s26 = sshll.u32 %s1335_s16, 10 }
  0x7e   : > { %s924_s16 = scalar_lea.sflag [#allocation4], %s1460_s5 }
  0x81   : > { %285 = vrot.lane.b32.xlu1 %v1480_v3, %s1286_s30  ;;  %283 = vrot.lane.b32.xlu0 %v1472_v1, %s1286_s30 }
  0x85   : > { %289 = vrot.lane.b32.xlu1 %v1478_v2, %s1286_s30  ;;  %287 = vrot.lane.b32.xlu0 %v1470_v0, %s1286_s30 }
  0x89   : > { %293 = vrot.lane.b32.xlu1 %v1486_v4, %s1286_s30  ;;  %291 = vrot.lane.b32.xlu0 %v1488_v5, %s1286_s30 }
  0x8d   : > { %297 = vrot.lane.b32.xlu1 %v1494_v6, %s1286_s30  ;;  %295 = vrot.lane.b32.xlu0 %v1496_v7, %s1286_s30  ;;  %s938_s30 = sshll.u32 %s1714_s23, 4  ;;  %s1822_s30 = int_to_ptr.vmem [resolvable:$true] %s938_s30 }
  0x91   : > { %309 = vrot.lane.b32.xlu1 %v1480_v3, %s1287_s6  ;;  %307 = vrot.lane.b32.xlu0 %v1472_v1, %s1287_s6 }
  0x95   : > { %313 = vrot.lane.b32.xlu1 %v1478_v2, %s1287_s6  ;;  %311 = vrot.lane.b32.xlu0 %v1470_v0, %s1287_s6 }
  0x99   : > { %317 = vrot.lane.b32.xlu1 %v1486_v4, %s1287_s6  ;;  %315 = vrot.lane.b32.xlu0 %v1488_v5, %s1287_s6 }
  0x9d   : > { %321 = vrot.lane.b32.xlu1 %v1494_v6, %s1287_s6  ;;  %319 = vrot.lane.b32.xlu0 %v1496_v7, %s1287_s6 }
  0xd3   : > { %v240_v8 = vpop.permute.xlu1 %239  ;;  %v236_v9 = vpop.permute.xlu0 %235 }
  0xd4   : > { %v332_v32 = vsel %vm331_vm0, %v236_v9, %v1472_v1  ;;  %v334_v43 = vsel %vm331_vm0, %v240_v8, %v1470_v0 }
  0xd7   : > { %v242_v10 = vpop.permute.xlu1 %241  ;;  %v238_v11 = vpop.permute.xlu0 %237 }
  0xd8   : > { %v333_v33 = vsel %vm331_vm0, %v238_v11, %v1480_v3  ;;  %v335_v44 = vsel %vm331_vm0, %v242_v10, %v1478_v2 }
  0xdb   : > { %v246_v12 = vpop.permute.xlu1 %245  ;;  %v244_v13 = vpop.permute.xlu0 %243 }
  0xdc   : > { %v337_v55 = vsel %vm331_vm0, %v246_v12, %v1486_v4  ;;  %v336_v56 = vsel %vm331_vm0, %v244_v13, %v1488_v5 }
  0xdf   : > { %v1526_v14 = vpop.permute.xlu1 %249  ;;  %v1528_v15 = vpop.permute.xlu0 %247 }
  0xe0   : > { %v339_v3 = vsel %vm331_vm0, %v1526_v14, %v1494_v6  ;;  %v338_v4 = vsel %vm331_vm0, %v1528_v15, %v1496_v7 }
  0xe3   : > { %v262_v16 = vpop.permute.xlu1 %261  ;;  %v260_v17 = vpop.permute.xlu0 %259 }
  0xe4   : > { %v342_v34 = vsel %vm340_vm1, %v333_v33, %v262_v16  ;;  %v341_v35 = vsel %vm340_vm1, %v332_v32, %v260_v17  ;;  %v428_v17 = vstv %s1048_s11  ;;  %s1203_s11 = scalar_lea.vmem %s1822_s30, 1024 }
  0xe5   : > { %p1204_p5 = scmp.ne.s32.totalorder %s1822_s30, %s1203_s11 }
  0xe7   : > { %v266_v18 = vpop.permute.xlu1 %265  ;;  %v264_v19 = vpop.permute.xlu0 %263  ;;  %p1205_p8 = pnand %p1204_p5, %p1893_p2 }
  0xe8   : > { %v344_v47 = vsel %vm340_vm1, %v335_v44, %v266_v18  ;;  %v343_v48 = vsel %vm340_vm1, %v334_v43, %v264_v19 }
  0xe9   : > { %p1206_p10 = pneg %p1205_p8 }
  0xeb   : > { %v270_v20 = vpop.permute.xlu1 %269  ;;  %v268_v21 = vpop.permute.xlu0 %267 }
  0xec   : > { %v346_v59 = vsel %vm340_vm1, %v337_v55, %v270_v20  ;;  %v345_v60 = vsel %vm340_vm1, %v336_v56, %v268_v21 }
  0xef   : > { %v274_v22 = vpop.permute.xlu1 %273  ;;  %v272_v23 = vpop.permute.xlu0 %271 }
  0xf0   : > { %v348_v9 = vsel %vm340_vm1, %v339_v3, %v274_v22  ;;  %v347_v10 = vsel %vm340_vm1, %v338_v4, %v272_v23 }
  0xf3   : > { %v286_v24 = vpop.permute.xlu1 %285  ;;  %v284_v25 = vpop.permute.xlu0 %283 }
  0xf4   : > { %v351_v37 = vsel %vm349_vm2, %v342_v34, %v286_v24  ;;  %v350_v38 = vsel %vm349_vm2, %v341_v35, %v284_v25  ;;  %v528_v35 = vstv %s1050_s19 }
  0xf7   : > { %v290_v26 = vpop.permute.xlu1 %289  ;;  %v288_v27 = vpop.permute.xlu0 %287 }
  0xf8   : > { %v353_v49 = vsel %vm349_vm2, %v344_v47, %v290_v26  ;;  %v352_v50 = vsel %vm349_vm2, %v343_v48, %v288_v27  ;;  %v478_v26 = vstv %s1049_s17  ;;  %s1291_s17 = smov [#allocation9]  }
  0xfb   : > { %v294_v28 = vpop.permute.xlu1 %293  ;;  %v292_v29 = vpop.permute.xlu0 %291 }
  0xfc   : > { %v355_v61 = vsel %vm349_vm2, %v346_v59, %v294_v28  ;;  %v354_v62 = vsel %vm349_vm2, %v345_v60, %v292_v29 }
  0xff   : > { %v298_v30 = vpop.permute.xlu1 %297  ;;  %v296_v31 = vpop.permute.xlu0 %295 }
 0x100   : > { %v357_v11 = vsel %vm349_vm2, %v348_v9, %v298_v30  ;;  %v356_v12 = vsel %vm349_vm2, %v347_v10, %v296_v31 }
 0x103   : > { %v310_v39 = vpop.permute.xlu1 %309  ;;  %v308_v40 = vpop.permute.xlu0 %307 }
 0x104   : > { %v1539_v41 = vsel %vm358_vm3, %v351_v37, %v310_v39  ;;  %v1542_v42 = vsel %vm358_vm3, %v350_v38, %v308_v40 }
 0x105   : > { %v380_v45 = vmul.f32 %v378_v36, %v1539_v41  ;;  %v379_v46 = vmul.f32 %v378_v36, %v1542_v42  ;;  %v430_v18 = vmul.f32 %v428_v17, %v1539_v41  ;;  %v429_v19 = vmul.f32 %v428_v17, %v1542_v42 }
 0x106   : > { %v480_v27 = vmul.f32 %v478_v26, %v1539_v41  ;;  %v479_v28 = vmul.f32 %v478_v26, %v1542_v42  ;;  %v529_v37 = vmul.f32 %v528_v35, %v1542_v42 }
 0x107   : > { %v314_v51 = vpop.permute.xlu1 %313  ;;  %397 = vrot.lane.b32.xlu1 %v380_v45, %s1288_s9  ;;  %395 = vrot.lane.b32.xlu0 %v379_v46, %s1288_s9  ;;  %v312_v52 = vpop.permute.xlu0 %311 }
 0x108   : > { %v1557_v53 = vsel %vm358_vm3, %v353_v49, %v314_v51  ;;  %v1560_v54 = vsel %vm358_vm3, %v352_v50, %v312_v52  ;;  %v368_v52 = vstv %s367_s22 }
 0x109   : > { %v382_v57 = vmul.f32 %v378_v36, %v1557_v53  ;;  %v381_v58 = vmul.f32 %v378_v36, %v1560_v54  ;;  %v432_v20 = vmul.f32 %v428_v17, %v1557_v53  ;;  %v431_v21 = vmul.f32 %v428_v17, %v1560_v54 }
 0x10a   : > { %v482_v29 = vmul.f32 %v478_v26, %v1557_v53  ;;  %v481_v30 = vmul.f32 %v478_v26, %v1560_v54  ;;  %v532_v38 = vmul.f32 %v528_v35, %v1557_v53  ;;  %v531_v39 = vmul.f32 %v528_v35, %v1560_v54 }
 0x10b   : > { %v318_v63 = vpop.permute.xlu1 %317  ;;  %401 = vrot.lane.b32.xlu1 %v382_v57, %s1288_s9  ;;  %399 = vrot.lane.b32.xlu0 %v381_v58, %s1288_s9  ;;  %v316_v0 = vpop.permute.xlu0 %315 }
 0x10c   : > { %v1575_v1 = vsel %vm358_vm3, %v355_v61, %v318_v63  ;;  %v1578_v2 = vsel %vm358_vm3, %v354_v62, %v316_v0 }
 0x10d   : > { %v384_v5 = vmul.f32 %v378_v36, %v1575_v1  ;;  %v383_v8 = vmul.f32 %v378_v36, %v1578_v2  ;;  %v434_v22 = vmul.f32 %v428_v17, %v1575_v1  ;;  %v433_v23 = vmul.f32 %v428_v17, %v1578_v2 }
 0x10e   : > { %v484_v31 = vmul.f32 %v478_v26, %v1575_v1  ;;  %v483_v32 = vmul.f32 %v478_v26, %v1578_v2  ;;  %v534_v40 = vmul.f32 %v528_v35, %v1575_v1  ;;  %v533_v43 = vmul.f32 %v528_v35, %v1578_v2 }
 0x10f   : > { %v322_v13 = vpop.permute.xlu1 %321  ;;  %405 = vrot.lane.b32.xlu1 %v384_v5, %s1288_s9  ;;  %403 = vrot.lane.b32.xlu0 %v383_v8, %s1288_s9  ;;  %v320_v6 = vpop.permute.xlu0 %319 }
 0x110   : > { %v1595_v7 = vsel %vm358_vm3, %v357_v11, %v322_v13  ;;  %v1598_v14 = vsel %vm358_vm3, %v356_v12, %v320_v6 }
 0x111   : > { %v386_v15 = vmul.f32 %v378_v36, %v1595_v7  ;;  %v385_v16 = vmul.f32 %v378_v36, %v1598_v14  ;;  %v436_v24 = vmul.f32 %v428_v17, %v1595_v7  ;;  %v435_v25 = vmul.f32 %v428_v17, %v1598_v14 }
 0x112   : > { %v486_v33 = vmul.f32 %v478_v26, %v1595_v7  ;;  %v485_v34 = vmul.f32 %v478_v26, %v1598_v14  ;;  %v530_v36 = vmul.f32 %v528_v35, %v1539_v41  ;;  %v536_v44 = vmul.f32 %v528_v35, %v1595_v7 }
 0x113   : > { %409 = vrot.lane.b32.xlu1 %v386_v15, %s1288_s9  ;;  %407 = vrot.lane.b32.xlu0 %v385_v16, %s1288_s9  ;;  %v535_v45 = vmul.f32 %v528_v35, %v1598_v14  ;;  %v376_v55 = vmul.f32 %v368_v52, %v1595_v7  ;;  %v375_v56 = vmul.f32 %v368_v52, %v1598_v14  ;;  %s1820_s9 = scalar_lea.hbm %s1873_s3, %s1064_s26 }
 0x114   : > { %v370_v7 = vmul.f32 %v368_v52, %v1539_v41  ;;  %v369_v14 = vmul.f32 %v368_v52, %v1542_v42  ;;  %v372_v17 = vmul.f32 %v368_v52, %v1557_v53  ;;  %v1646_v41 = vstv %s1052_s29 }
 0x115   : > { %v1650_v53 = vstv %s1054_s28 }
 0x117   : > { %447 = vrot.lane.b32.xlu1 %v430_v18, %s1284_s4  ;;  %445 = vrot.lane.b32.xlu0 %v429_v19, %s1284_s4  ;;  %v371_v18 = vmul.f32 %v368_v52, %v1560_v54  ;;  %v374_v19 = vmul.f32 %v368_v52, %v1575_v1 }
 0x11b   : > { %451 = vrot.lane.b32.xlu1 %v432_v20, %s1284_s4  ;;  %449 = vrot.lane.b32.xlu0 %v431_v21, %s1284_s4  ;;  %v373_v20 = vmul.f32 %v368_v52, %v1578_v2 }
 0x11f   : > { %455 = vrot.lane.b32.xlu1 %v434_v22, %s1284_s4  ;;  %453 = vrot.lane.b32.xlu0 %v433_v23, %s1284_s4 }
 0x123   : > { %459 = vrot.lane.b32.xlu1 %v436_v24, %s1284_s4  ;;  %457 = vrot.lane.b32.xlu0 %v435_v25, %s1284_s4  ;;  %s652_s4 = sld [smem:[#allocation2]]  ;;  %v1644_v25 = vstv %s1051_s27 }
 0x127   : > { %497 = vrot.lane.b32.xlu1 %v480_v27, %s1289_s10  ;;  %495 = vrot.lane.b32.xlu0 %v479_v28, %s1289_s10  ;;  %v1648_v27 = vstv %s1053_s7 }
 0x12b   : > { %501 = vrot.lane.b32.xlu1 %v482_v29, %s1289_s10  ;;  %499 = vrot.lane.b32.xlu0 %v481_v30, %s1289_s10 }
 0x12f   : > { %505 = vrot.lane.b32.xlu1 %v484_v31, %s1289_s10  ;;  %503 = vrot.lane.b32.xlu0 %v483_v32, %s1289_s10  ;;  %v1652_v32 = vstv %s652_s4 }
 0x133   : > { %509 = vrot.lane.b32.xlu1 %v486_v33, %s1289_s10  ;;  %507 = vrot.lane.b32.xlu0 %v485_v34, %s1289_s10  ;;  %s1207_s10 = sshll.u32 %s1291_s17, 4  ;;  %s1208_s10 = int_to_ptr.vmem [resolvable:$false] %s1207_s10 }
 0x134   : > { %s1209_s19 = scalar_lea.vmem %s1208_s10, 2048  ;;  %p1210_p4 = scmp.lt.s32.totalorder %s1822_s30, %s1208_s10 }
 0x135   : > { %p1211_p12 = scmp.lt.s32.totalorder %s1209_s19, %s1203_s11 }
 0x137   : > { %547 = vrot.lane.b32.xlu1 %v530_v36, %s1290_s20  ;;  %545 = vrot.lane.b32.xlu0 %v529_v37, %s1290_s20  ;;  %p1212_p0 = por %p1211_p12, %p1210_p4 }
 0x139   : > { %p1213_p7 = pnand %p1212_p0, %p1206_p10 }
 0x13b   : > { %551 = vrot.lane.b32.xlu1 %v532_v38, %s1290_s20  ;;  %549 = vrot.lane.b32.xlu0 %v531_v39, %s1290_s20 }
 0x13f   : > { %555 = vrot.lane.b32.xlu1 %v534_v40, %s1290_s20  ;;  %553 = vrot.lane.b32.xlu0 %v533_v43, %s1290_s20 }
 0x143   : > { %559 = vrot.lane.b32.xlu1 %v536_v44, %s1290_s20  ;;  %557 = vrot.lane.b32.xlu0 %v535_v45, %s1290_s20 }
 0x179   : > { %v398_v46 = vpop.permute.xlu1 %397  ;;  %v396_v47 = vpop.permute.xlu0 %395 }
 0x17a   : > { %v420_v15 = vadd.f32 %v398_v46, %v370_v7  ;;  %v419_v16 = vadd.f32 %v396_v47, %v369_v14 }
 0x17d   : > { %v402_v48 = vpop.permute.xlu1 %401  ;;  %v400_v49 = vpop.permute.xlu0 %399 }
 0x17e   : > { %v422_v42 = vadd.f32 %v402_v48, %v372_v17  ;;  %v421_v26 = vadd.f32 %v400_v49, %v371_v18 }
 0x181   : > { %v406_v50 = vpop.permute.xlu1 %405  ;;  %v404_v51 = vpop.permute.xlu0 %403 }
 0x182   : > { %v424_v54 = vadd.f32 %v406_v50, %v374_v19  ;;  %v423_v1 = vadd.f32 %v404_v51, %v373_v20 }
 0x185   : > { %v410_v57 = vpop.permute.xlu1 %409  ;;  %v408_v58 = vpop.permute.xlu0 %407 }
 0x186   : > { %v426_v59 = vadd.f32 %v410_v57, %v376_v55  ;;  %v425_v60 = vadd.f32 %v408_v58, %v375_v56 }
 0x189   : > { %v448_v61 = vpop.permute.xlu1 %447  ;;  %v446_v62 = vpop.permute.xlu0 %445 }
 0x18a   : > { %v470_v23 = vadd.f32 %v448_v61, %v420_v15  ;;  %v469_v24 = vadd.f32 %v446_v62, %v419_v16 }
 0x18d   : > { %v452_v63 = vpop.permute.xlu1 %451  ;;  %v450_v0 = vpop.permute.xlu0 %449 }
 0x18e   : > { %v472_v29 = vadd.f32 %v452_v63, %v422_v42  ;;  %v471_v30 = vadd.f32 %v450_v0, %v421_v26 }
 0x191   : > { %v456_v3 = vpop.permute.xlu1 %455  ;;  %v454_v4 = vpop.permute.xlu0 %453 }
 0x192   : > { %v474_v34 = vadd.f32 %v456_v3, %v424_v54  ;;  %v473_v35 = vadd.f32 %v454_v4, %v423_v1 }
 0x195   : > { %v460_v5 = vpop.permute.xlu1 %459  ;;  %v458_v8 = vpop.permute.xlu0 %457 }
 0x196   : > { %v476_v38 = vadd.f32 %v460_v5, %v426_v59  ;;  %v475_v39 = vadd.f32 %v458_v8, %v425_v60 }
 0x199   : > { %v498_v9 = vpop.permute.xlu1 %497  ;;  %v496_v10 = vpop.permute.xlu0 %495 }
 0x19a   : > { %v520_v28 = vadd.f32 %v498_v9, %v470_v23  ;;  %v519_v2 = vadd.f32 %v496_v10, %v469_v24 }
 0x19d   : > { %v502_v11 = vpop.permute.xlu1 %501  ;;  %v500_v12 = vpop.permute.xlu0 %499 }
 0x19e   : > { %v522_v40 = vadd.f32 %v502_v11, %v472_v29  ;;  %v521_v43 = vadd.f32 %v500_v12, %v471_v30 }
 0x1a1   : > { %v506_v13 = vpop.permute.xlu1 %505  ;;  %v504_v6 = vpop.permute.xlu0 %503 }
 0x1a2   : > { %v1654_v48 = vadd.f32 %v506_v13, %v474_v34  ;;  %v1656_v49 = vadd.f32 %v504_v6, %v473_v35 }
 0x1a5   : > { %v510_v21 = vpop.permute.xlu1 %509  ;;  %v508_v22 = vpop.permute.xlu0 %507 }
 0x1a6   : > { %v1658_v50 = vadd.f32 %v510_v21, %v476_v38  ;;  %v1660_v56 = vadd.f32 %v508_v22, %v475_v39 }
 0x1a9   : > { %v548_v31 = vpop.permute.xlu1 %547  ;;  %v546_v33 = vpop.permute.xlu0 %545 }
 0x1aa   : > { %v570_v36 = vadd.f32 %v548_v31, %v520_v28  ;;  %v569_v37 = vadd.f32 %v546_v33, %v519_v2 }
 0x1ac   : > { %v595_v44 = vrot.slane %v570_v36, 6  ;;  %v618_v45 = vrot.slane %v570_v36, 4  ;;  %v626_v46 = vrot.slane %v570_v36, 2  ;;  %v581_v47 = vrot.slane %v569_v37, 2 }
 0x1ad   : > { %v594_v51 = vrot.slane %v569_v37, 6  ;;  %v552_v52 = vpop.permute.xlu1 %551  ;;  %v550_v55 = vpop.permute.xlu0 %549 }
 0x1ae   : > { %v643_v57 = vsel %vm593_vm4, %v595_v44, %v618_v45  ;;  %v635_v58 = vsel %vm634_vm6, %v581_v47, %v569_v37  ;;  %v1664_v59 = vadd.f32 %v552_v52, %v522_v40  ;;  %v1669_v63 = vadd.f32 %v550_v55, %v521_v43 }
 0x1af   : > { %v648_v60 = vsel %vm647_vm5, %v643_v57, %v626_v46  ;;  %v596_v61 = vsel %vm593_vm4, %v594_v51, %v595_v44  ;;  %v639_v62 = vsel %vm593_vm4, %v635_v58, %v594_v51 }
 0x1b0   : > { %v666_v0 = vmul.f32 %v1644_v25, %v648_v60  ;;  %v729_v3 = vmul.f32 %v1646_v41, %v648_v60  ;;  %v792_v4 = vmul.f32 %v1648_v27, %v648_v60  ;;  %v855_v5 = vmul.f32 %v1650_v53, %v648_v60 }
 0x1b1   : > { %v654_v8 = vmul.f32 %v1652_v32, %v639_v62  ;;  %v655_v9 = vmul.f32 %v1652_v32, %v596_v61  ;;  %v664_v10 = vmul.f32 %v1644_v25, %v639_v62  ;;  %v665_v11 = vmul.f32 %v1644_v25, %v596_v61  ;;  %v556_v37 = vpop.permute.xlu1 %555  ;;  %v554_v38 = vpop.permute.xlu0 %553 }
 0x1b2   : > { %v692_v12 = vrot.slane %v666_v0, 1  ;;  %v755_v13 = vrot.slane %v729_v3, 2  ;;  %v818_v6 = vrot.slane %v792_v4, 3  ;;  %v881_v7 = vrot.slane %v855_v5, 4 }
 0x1b3   : > { %v689_v14 = vrot.slane %v664_v10, 1  ;;  %v690_v15 = vrot.slane %v665_v11, 1  ;;  %v727_v16 = vmul.f32 %v1646_v41, %v639_v62  ;;  %v728_v17 = vmul.f32 %v1646_v41, %v596_v61 }
 0x1b4   : > { %v790_v18 = vmul.f32 %v1648_v27, %v639_v62  ;;  %v791_v19 = vmul.f32 %v1648_v27, %v596_v61  ;;  %v853_v20 = vmul.f32 %v1650_v53, %v639_v62  ;;  %v854_v21 = vmul.f32 %v1650_v53, %v596_v61 }
 0x1b5   : > { %v691_v22 = vsel %vm688_vm7, %v689_v14, %v690_v15  ;;  %v693_v23 = vsel %vm688_vm7, %v690_v15, %v692_v12  ;;  %v752_v24 = vrot.slane %v727_v16, 2  ;;  %v753_v42 = vrot.slane %v728_v17, 2 }
 0x1b6   : > { %v717_v26 = vadd.f32 %v691_v22, %v654_v8  ;;  %v718_v54 = vadd.f32 %v693_v23, %v655_v9  ;;  %v815_v1 = vrot.slane %v790_v18, 3  ;;  %v816_v28 = vrot.slane %v791_v19, 3 }
 0x1b7   : > { %v754_v2 = vsel %vm751_vm8, %v752_v24, %v753_v42  ;;  %v756_v29 = vsel %vm751_vm8, %v753_v42, %v755_v13  ;;  %v878_v30 = vrot.slane %v853_v20, 4  ;;  %v879_v31 = vrot.slane %v854_v21, 4 }
 0x1b8   : > { %v780_v33 = vadd.f32 %v754_v2, %v717_v26  ;;  %v781_v34 = vadd.f32 %v756_v29, %v718_v54  ;;  %v817_v35 = vsel %vm814_vm9, %v815_v1, %v816_v28  ;;  %v819_v36 = vsel %vm814_vm9, %v816_v28, %v818_v6 }
 0x1b9   : > { %v880_v39 = vsel %vm877_vm10, %v878_v30, %v879_v31  ;;  %v882_v40 = vsel %vm877_vm10, %v879_v31, %v881_v7  ;;  %v598_v43 = vrot.slane %v1664_v59, 6  ;;  %v619_v44 = vrot.slane %v1664_v59, 4 }
 0x1ba   : > { %v843_v45 = vadd.f32 %v817_v35, %v780_v33  ;;  %v844_v46 = vadd.f32 %v819_v36, %v781_v34  ;;  %v627_v47 = vrot.slane %v1664_v59, 2  ;;  %v582_v51 = vrot.slane %v1669_v63, 2  ;;  %v560_v34 = vpop.permute.xlu1 %559 }
 0x1bb   : > { %v644_v52 = vsel %vm593_vm4, %v598_v43, %v619_v44  ;;  %v597_v55 = vrot.slane %v1669_v63, 6  ;;  %v1700_v57 = vadd.f32 %v556_v37, %v1654_v48  ;;  %v1703_v58 = vadd.f32 %v554_v38, %v1656_v49 }
 0x1bc   : > { %v906_v60 = vadd.f32 %v880_v39, %v843_v45  ;;  %v907_v61 = vadd.f32 %v882_v40, %v844_v46  ;;  %v649_v62 = vsel %vm647_vm5, %v644_v52, %v627_v47  ;;  %v636_v0 = vsel %vm634_vm6, %v582_v51, %v1669_v63  ;;  %v558_v39 = vpop.permute.xlu0 %557 }
 0x1bd   : > { %v669_v59 = vmul.f32 %v1644_v25, %v649_v62  ;;  %v732_v3 = vmul.f32 %v1646_v41, %v649_v62  ;;  %v795_v4 = vmul.f32 %v1648_v27, %v649_v62  ;;  %v858_v5 = vmul.f32 %v1650_v53, %v649_v62 }
 0x1be   : > { %915 = vst.msk [vmem:[%s1714_s23] sm:$0xff] %vm914_vm11, %v906_v60  ;;  %916 = vst.msk [vmem:[%s1714_s23 + $0x8] sm:$0xff] %vm914_vm11, %v907_v61  ;;  %v599_v48 = vsel %vm593_vm4, %v597_v55, %v598_v43  ;;  %v640_v49 = vsel %vm593_vm4, %v636_v0, %v597_v55  ;;  %v601_v63 = vrot.slane %v1700_v57, 6  ;;  %v620_v8 = vrot.slane %v1700_v57, 4 }
 0x1bf   : > { %v697_v9 = vrot.slane %v669_v59, 1  ;;  %v760_v10 = vrot.slane %v732_v3, 2  ;;  %v823_v11 = vrot.slane %v795_v4, 3  ;;  %v886_v12 = vrot.slane %v858_v5, 4 }
 0x1c0   : > { %v656_v13 = vmul.f32 %v1652_v32, %v640_v49  ;;  %v657_v6 = vmul.f32 %v1652_v32, %v599_v48  ;;  %v667_v7 = vmul.f32 %v1644_v25, %v640_v49  ;;  %v668_v14 = vmul.f32 %v1644_v25, %v599_v48 }
 0x1c1   : > { %v730_v15 = vmul.f32 %v1646_v41, %v640_v49  ;;  %v731_v16 = vmul.f32 %v1646_v41, %v599_v48  ;;  %v793_v17 = vmul.f32 %v1648_v27, %v640_v49  ;;  %v794_v18 = vmul.f32 %v1648_v27, %v599_v48 }
 0x1c2   : > { %v694_v19 = vrot.slane %v667_v7, 1  ;;  %v695_v20 = vrot.slane %v668_v14, 1  ;;  %v856_v21 = vmul.f32 %v1650_v53, %v640_v49  ;;  %v857_v22 = vmul.f32 %v1650_v53, %v599_v48 }
 0x1c3   : > { %v757_v23 = vrot.slane %v730_v15, 2  ;;  %v758_v24 = vrot.slane %v731_v16, 2  ;;  %v820_v42 = vrot.slane %v793_v17, 3  ;;  %v821_v26 = vrot.slane %v794_v18, 3 }
 0x1c4   : > { %v696_v54 = vsel %vm688_vm7, %v694_v19, %v695_v20  ;;  %v698_v1 = vsel %vm688_vm7, %v695_v20, %v697_v9  ;;  %v883_v28 = vrot.slane %v856_v21, 4  ;;  %v884_v2 = vrot.slane %v857_v22, 4 }
 0x1c5   : > { %v719_v29 = vadd.f32 %v696_v54, %v656_v13  ;;  %v720_v30 = vadd.f32 %v698_v1, %v657_v6  ;;  %v759_v31 = vsel %vm751_vm8, %v757_v23, %v758_v24  ;;  %v761_v33 = vsel %vm751_vm8, %v758_v24, %v760_v10 }
 0x1c6   : > { %v822_v35 = vsel %vm814_vm9, %v820_v42, %v821_v26  ;;  %v824_v36 = vsel %vm814_vm9, %v821_v26, %v823_v11  ;;  %v885_v37 = vsel %vm877_vm10, %v883_v28, %v884_v2  ;;  %v887_v38 = vsel %vm877_vm10, %v884_v2, %v886_v12 }
 0x1c7   : > { %v782_v40 = vadd.f32 %v759_v31, %v719_v29  ;;  %v783_v43 = vadd.f32 %v761_v33, %v720_v30  ;;  %v628_v44 = vrot.slane %v1700_v57, 2  ;;  %v645_v45 = vsel %vm593_vm4, %v601_v63, %v620_v8 }
 0x1c8   : > { %v583_v46 = vrot.slane %v1703_v58, 2  ;;  %v600_v47 = vrot.slane %v1703_v58, 6  ;;  %v576_v51 = vadd.f32 %v560_v34, %v1658_v50  ;;  %v1749_v61 = vadd.f32 %v558_v39, %v1660_v56 }
 0x1c9   : > { %v845_v52 = vadd.f32 %v822_v35, %v782_v40  ;;  %v846_v55 = vadd.f32 %v824_v36, %v783_v43  ;;  %v650_v60 = vsel %vm647_vm5, %v645_v45, %v628_v44 }
 0x1ca   : > { %v672_v62 = vmul.f32 %v1644_v25, %v650_v60  ;;  %v735_v57 = vmul.f32 %v1646_v41, %v650_v60  ;;  %v798_v0 = vmul.f32 %v1648_v27, %v650_v60  ;;  %v861_v59 = vmul.f32 %v1650_v53, %v650_v60 }
 0x1cb   : > { %v908_v3 = vadd.f32 %v885_v37, %v845_v52  ;;  %v909_v4 = vadd.f32 %v887_v38, %v846_v55  ;;  %v602_v50 = vsel %vm593_vm4, %v600_v47, %v601_v63  ;;  %v637_v5 = vsel %vm634_vm6, %v583_v46, %v1703_v58 }
 0x1cc   : > { %v702_v48 = vrot.slane %v672_v62, 1  ;;  %v765_v49 = vrot.slane %v735_v57, 2  ;;  %v828_v8 = vrot.slane %v798_v0, 3  ;;  %v891_v56 = vrot.slane %v861_v59, 4 }
 0x1cd   : > { %917 = vst.msk [vmem:[%s1714_s23 + $0x10] sm:$0xff] %vm914_vm11, %v908_v3  ;;  %918 = vst.msk [vmem:[%s1714_s23 + $0x18] sm:$0xff] %vm914_vm11, %v909_v4  ;;  %v641_v9 = vsel %vm593_vm4, %v637_v5, %v600_v47  ;;  %v659_v10 = vmul.f32 %v1652_v32, %v602_v50  ;;  %v671_v11 = vmul.f32 %v1644_v25, %v602_v50  ;;  %v604_v30 = vrot.slane %v576_v51, 6 }
 0x1ce   : > { %v734_v12 = vmul.f32 %v1646_v41, %v602_v50  ;;  %v658_v63 = vmul.f32 %v1652_v32, %v641_v9  ;;  %v670_v58 = vmul.f32 %v1644_v25, %v641_v9  ;;  %v733_v13 = vmul.f32 %v1646_v41, %v641_v9 }
 0x1cf   : > { %v796_v6 = vmul.f32 %v1648_v27, %v641_v9  ;;  %v700_v7 = vrot.slane %v671_v11, 1  ;;  %v797_v15 = vmul.f32 %v1648_v27, %v602_v50  ;;  %v859_v16 = vmul.f32 %v1650_v53, %v641_v9 }
 0x1d0   : > { %v763_v14 = vrot.slane %v734_v12, 2  ;;  %v699_v17 = vrot.slane %v670_v58, 1  ;;  %v762_v18 = vrot.slane %v733_v13, 2  ;;  %v860_v20 = vmul.f32 %v1650_v53, %v602_v50 }
 0x1d1   : > { %v825_v19 = vrot.slane %v796_v6, 3  ;;  %v703_v21 = vsel %vm688_vm7, %v700_v7, %v702_v48  ;;  %v826_v23 = vrot.slane %v797_v15, 3  ;;  %v888_v24 = vrot.slane %v859_v16, 4 }
 0x1d2   : > { %v766_v22 = vsel %vm751_vm8, %v763_v14, %v765_v49  ;;  %v701_v42 = vsel %vm688_vm7, %v699_v17, %v700_v7  ;;  %v722_v26 = vadd.f32 %v703_v21, %v659_v10  ;;  %v764_v54 = vsel %vm751_vm8, %v762_v18, %v763_v14 }
 0x1d3   : > { %v889_v1 = vrot.slane %v860_v20, 4  ;;  %v721_v28 = vadd.f32 %v701_v42, %v658_v63  ;;  %v827_v2 = vsel %vm814_vm9, %v825_v19, %v826_v23  ;;  %v829_v29 = vsel %vm814_vm9, %v826_v23, %v828_v8 }
 0x1d4   : > { %v785_v31 = vadd.f32 %v766_v22, %v722_v26  ;;  %v621_v35 = vrot.slane %v576_v51, 4  ;;  %v629_v37 = vrot.slane %v576_v51, 2  ;;  %v584_v38 = vrot.slane %v1749_v61, 2 }
 0x1d5   : > { %v890_v33 = vsel %vm877_vm10, %v888_v24, %v889_v1  ;;  %v892_v34 = vsel %vm877_vm10, %v889_v1, %v891_v56  ;;  %v784_v36 = vadd.f32 %v764_v54, %v721_v28  ;;  %v603_v39 = vrot.slane %v1749_v61, 6 }
 0x1d6   : > { %v848_v40 = vadd.f32 %v829_v29, %v785_v31  ;;  %v646_v43 = vsel %vm593_vm4, %v604_v30, %v621_v35  ;;  %v638_v47 = vsel %vm634_vm6, %v584_v38, %v1749_v61 }
 0x1d7   : > { %v847_v44 = vadd.f32 %v827_v2, %v784_v36  ;;  %v651_v45 = vsel %vm647_vm5, %v646_v43, %v629_v37  ;;  %v605_v46 = vsel %vm593_vm4, %v603_v39, %v604_v30  ;;  %v642_v0 = vsel %vm593_vm4, %v638_v47, %v603_v39 }
 0x1d8   : > { %v911_v52 = vadd.f32 %v892_v34, %v848_v40  ;;  %v675_v51 = vmul.f32 %v1644_v25, %v651_v45  ;;  %v738_v55 = vmul.f32 %v1646_v41, %v651_v45  ;;  %v801_v60 = vmul.f32 %v1648_v27, %v651_v45 }
 0x1d9   : > { %v910_v62 = vadd.f32 %v890_v33, %v847_v44  ;;  %v864_v57 = vmul.f32 %v1650_v53, %v651_v45  ;;  %v661_v59 = vmul.f32 %v1652_v32, %v605_v46  ;;  %v660_v61 = vmul.f32 %v1652_v32, %v642_v0 }
 0x1da   : > { %920 = vst.msk [vmem:[%s1714_s23 + $0x28] sm:$0xff] %vm914_vm11, %v911_v52  ;;  %v707_v3 = vrot.slane %v675_v51, 1  ;;  %v770_v4 = vrot.slane %v738_v55, 2  ;;  %v833_v50 = vrot.slane %v801_v60, 3  ;;  %v673_v48 = vmul.f32 %v1644_v25, %v642_v0 }
 0x1db   : > { %919 = vst.msk [vmem:[%s1714_s23 + $0x20] sm:$0xff] %vm914_vm11, %v910_v62  ;;  %v896_v5 = vrot.slane %v864_v57, 4  ;;  %v674_v49 = vmul.f32 %v1644_v25, %v605_v46  ;;  %v736_v8 = vmul.f32 %v1646_v41, %v642_v0  ;;  %v737_v56 = vmul.f32 %v1646_v41, %v605_v46 }
 0x1dc   : > { %v799_v9 = vmul.f32 %v1648_v27, %v642_v0  ;;  %v800_v10 = vmul.f32 %v1648_v27, %v605_v46  ;;  %v862_v11 = vmul.f32 %v1650_v53, %v642_v0  ;;  %v704_v12 = vrot.slane %v673_v48, 1 }
 0x1dd   : > { %v705_v63 = vrot.slane %v674_v49, 1  ;;  %v767_v32 = vrot.slane %v736_v8, 2  ;;  %v863_v58 = vmul.f32 %v1650_v53, %v605_v46  ;;  %v768_v13 = vrot.slane %v737_v56, 2 }
 0x1de   : > { %v830_v6 = vrot.slane %v799_v9, 3  ;;  %v831_v7 = vrot.slane %v800_v10, 3  ;;  %v893_v25 = vrot.slane %v862_v11, 4 }
 0x1df   : > { %v706_v14 = vsel %vm688_vm7, %v704_v12, %v705_v63  ;;  %v708_v41 = vsel %vm688_vm7, %v705_v63, %v707_v3  ;;  %v894_v15 = vrot.slane %v863_v58, 4  ;;  %v769_v17 = vsel %vm751_vm8, %v767_v32, %v768_v13 }
 0x1e0   : > { %v723_v16 = vadd.f32 %v706_v14, %v660_v61  ;;  %v724_v27 = vadd.f32 %v708_v41, %v661_v59  ;;  %v771_v18 = vsel %vm751_vm8, %v768_v13, %v770_v4  ;;  %v832_v53 = vsel %vm814_vm9, %v830_v6, %v831_v7 }
 0x1e1   : > { %v834_v19 = vsel %vm814_vm9, %v831_v7, %v833_v50  ;;  %v895_v20 = vsel %vm877_vm10, %v893_v25, %v894_v15  ;;  %v897_v21 = vsel %vm877_vm10, %v894_v15, %v896_v5 }
 0x1e2   : > { %v786_v22 = vadd.f32 %v769_v17, %v723_v16  ;;  %v787_v23 = vadd.f32 %v771_v18, %v724_v27 }
 0x1e4   : > { %v849_v24 = vadd.f32 %v832_v53, %v786_v22  ;;  %v850_v42 = vadd.f32 %v834_v19, %v787_v23 }
 0x1e6   : > { %v912_v26 = vadd.f32 %v895_v20, %v849_v24  ;;  %v913_v54 = vadd.f32 %v897_v21, %v850_v42 }
 0x1e8   : > { %921 = vst.msk [vmem:[%s1714_s23 + $0x30] sm:$0xff] %vm914_vm11, %v912_v26  ;;  %922 = vst.msk [vmem:[%s1714_s23 + $0x38] sm:$0xff] %vm914_vm11, %v913_v54 }
 0x1e9   : > { %1216 = shalt.err (!%p1213_p7)
}
 0x1ea   : > { %s1217_s20 = scalar_lea.hbm %s1820_s9, 1024  ;;  %s1221_s29 = scalar_lea.hbm %s1873_s3, 2048 }
 0x1eb   : > { %p1218_p11 = scmp.ne.s32.totalorder %s1820_s9, %s1217_s20  ;;  %p1222_p9 = scmp.lt.u32.totalorder %s1820_s9, %s1873_s3 }
 0x1ec   : > { %p1223_p1 = scmp.lt.u32.totalorder %s1221_s29, %s1217_s20  ;;  %p1225_p5 = scmp.lt.u32.totalorder %s1217_s20, %s1820_s9 }
 0x1ed   : > { %p1219_p13 = pnand %p1218_p11, %p1893_p2 }
 0x1ee   : > { %p1224_p6 = por %p1223_p1, %p1222_p9 }
 0x1ef   : > { %p1220_p3 = pneg %p1219_p13 }
 0x1f0   : > { %p1226_p8 = por %p1225_p5, %p1224_p6 }
 0x1f2   : > { %p1227_p10 = pnand %p1226_p8, %p1220_p3 }
 0x1f4   : > { %1230 = shalt.err (!%p1227_p10)
}
 0x1f5   : > { %s1292_s4 = smov 128   ;;  %s1293_s23 = smov 8  }
 0x1f6   : > { %1075 = dma.vmem_to_hbm [thread:$0]  (%p1893_p2), %s1822_s30, 1024, %s1820_s9, %s924_s16, %s1292_s4, %s1292_s4, %s1293_s23  }
 0x1f7 PF: > { %s953_s26 = sand.u32 1, %s1265_s12   ;;  %p1894_p4 = scmp.ne.s32.totalorder %s1882_s25, 0 }
 0x1f8   : > { %p1895_p12 = scmp.ge.s32.totalorder %s1277_s15, 2  ;;  %s954_s6 = scalar_lea.sflag [#allocation4], %s953_s26 }
 0x1fa   : > { %p1089_p0 = pnand %p1895_p12, %p1894_p4 }
 0x1fc   : > { %1260 = dma.done.wait (!%p1089_p0), %s954_s6, 1024  }
 0x1fd   : > { %1262 = vsyncadd (!%p1089_p0), %s954_s6, 4294966272  ;;  %p18_p7 = scmp.ge.s32.totalorder %s1339_s18, 4   ;;  %s1896_s12 = smov %s1269_s13 }
 0x1fe   : > { %s1897_s13 = smov %s1273_s14  ;;  %s1898_s14 = smov %s1351_s21 }
 0x1ff   : > { %s1899_s15 = smov %s1339_s18  ;;  %20 = sbr.rel (!%p18_p7) target bundleno = 7 (0x7), region = 86 }
 0x206   :  { %959 = vsyncpa [#allocation3], 1 }
 0x207   :  { %961 = vsyncpa [#allocation3 + $0x1], 1 }
 0x208   :  { %962 = vsyncpa [#allocation4], 1 }
 0x209   :  { %964 = vsyncpa [#allocation4 + $0x1], 1 }
 0x20a   :  { %965 = vsyncpa [#allocation5], 1 }
 0x20b   :  { %967 = vsyncpa [#allocation5 + $0x1], 1 }
 0x20c   :  { %968 = vsyncpa [#allocation7], 1 }

</bundles_post_ra>
